<compile_context>
chip_gen: v5e
topology: v5e:2x2
jax: 0.10.0
libtpu: 0.0.40
codegen_flags: <defaults>
</compile_context>

<pallas_src>
import functools

import jax
import jax.numpy as jnp
from jax.experimental import pallas as pl
from jax.experimental.pallas import tpu as pltpu


def nfm_kernel(x_ref, xw_ref, linb_ref, w1t_ref, b1_ref, w2t_ref, b2_ref,
               out_ref, *, k_dim, output_dim):
    x = x_ref[...]                                               # (TB, F)

    # Single MXU pass for both x-contractions. linb is zero-padded over the
    # first K lanes, so the bias add only affects the linear columns.
    head = jnp.dot(x, xw_ref[...],
                   preferred_element_type=jnp.float32) + linb_ref[...]   # (TB, K+O)
    wemb = head[:, :k_dim]                                       # (TB, K) f32
    linear_out = head[:, k_dim:]                                 # (TB, O) f32

    # Interaction MLP: Identity -> Linear(K,K) -> ReLU -> Linear(K,O).
    # Weights were pre-transposed in the wrapper -> MXU-native contraction.
    h = jnp.dot(wemb.astype(w1t_ref.dtype), w1t_ref[...],
                preferred_element_type=jnp.float32) + b1_ref[...]
    h = jnp.maximum(h, 0.0)                                      # f32 VPU path
    inter = jnp.dot(h.astype(w2t_ref.dtype), w2t_ref[...],
                    preferred_element_type=jnp.float32) + b2_ref[...]
    combined = linear_out + inter                                # fused in-kernel

    # Packed slab [wemb | linear | inter | combined] via column-slice stores.
    ko = k_dim + output_dim
    out_ref[:, :ko] = head.astype(out_ref.dtype)
    out_ref[:, ko:ko + output_dim] = inter.astype(out_ref.dtype)
    out_ref[:, ko + output_dim:] = combined.astype(out_ref.dtype)
    # TODO(synk): n_out (= K + 3*O) lanes < 128 -> masked vst; a lane-dense
    # (tb*n_out/128, 128) in-kernel relayout of the slab could further cut
    # store cost once verified to lower to XLU relayout (not a VMEM copy).


def prepare_nfm_params(emb_w, lin_w, lin_b, w1, b1, w2, b2,
                       *, compute_dtype=jnp.float32):
    """One-time weight packing, hoisted out of the per-call hot path.

    emb_w: (F, K) embedding weights; lin_w: (O, F), lin_b: (O,);
    w1: (K, K), b1: (K,); w2: (O, K), b2: (O,)  (all PyTorch layouts).
    """
    F, K = emb_w.shape
    O = lin_w.shape[0]
    # Fused x-weight [emb_w | lin_w.T] -> (F, K+O): one MXU pass for both.
    xw = jnp.concatenate([emb_w, lin_w.T], axis=1).astype(compute_dtype)
    # Linear bias padded with zeros over the first K lanes -> (1, K+O).
    linb_pad = jnp.concatenate(
        [jnp.zeros((K,), jnp.float32), lin_b.astype(jnp.float32)]).reshape(1, K + O)
    return dict(
        xw=xw,
        linb_pad=linb_pad,
        w1t=w1.T.astype(compute_dtype),        # (K, K), contract on dim 0
        b1=b1.reshape(1, K).astype(jnp.float32),
        w2t=w2.T.astype(compute_dtype),        # (K, O)
        b2=b2.reshape(1, O).astype(jnp.float32),
        k_dim=K, output_dim=O, num_features=F,
        compute_dtype=jnp.dtype(compute_dtype),
    )


def nfm_forward(x, params, *, batch_tile=4096, out_dtype=jnp.float32):
    """x: (B, F). Returns (combined, linear_out, inter, wemb) like the module."""
    B, F = x.shape
    assert F == params["num_features"]
    K, O = params["k_dim"], params["output_dim"]
    compute_dtype = params["compute_dtype"]
    n_out = K + 3 * O

    x_c = x.astype(compute_dtype)

    # Batch tiling: big tiles (mem-bound regime), minimal zero-row padding,
    # and >=2 grid steps when the batch allows so both v7x TCs get work.
    row_align = 16 if jnp.dtype(compute_dtype).itemsize < 4 else 8
    n_steps = max(1, pl.cdiv(B, batch_tile))
    if B > 2 * row_align:
        n_steps = max(n_steps, 2)
    tb = pl.cdiv(pl.cdiv(B, n_steps), row_align) * row_align
    B_pad = n_steps * tb
    if B_pad != B:
        x_c = jnp.pad(x_c, ((0, B_pad - B), (0, 0)))

    def const(shape):
        n = len(shape)
        return pl.BlockSpec(shape, lambda i: (0,) * n)

    packed = pl.pallas_call(
        functools.partial(nfm_kernel, k_dim=K, output_dim=O),
        out_shape=jax.ShapeDtypeStruct((B_pad, n_out), out_dtype),
        grid=(n_steps,),
        in_specs=[
            pl.BlockSpec((tb, F), lambda i: (i, 0)),   # x: batch-tiled
            const((F, K + O)),                         # fused x-weight (VMEM-resident)
            const((1, K + O)),                         # zero-padded linear bias
            const((K, K)),                             # MLP layer-1 weight (pre-T)
            const((1, K)),                             # MLP layer-1 bias
            const((K, O)),                             # MLP layer-2 weight (pre-T)
            const((1, O)),                             # MLP layer-2 bias
        ],
        out_specs=pl.BlockSpec((tb, n_out), lambda i: (i, 0)),
        # Weights never change block index, so Pallas skips re-DMA per step.
        # (On v7x at production sizes, single-buffering them via
        #  pipeline_mode=pl.Buffered(1) reclaims VMEM for bigger batch tiles.)
        compiler_params=pltpu.CompilerParams(
            dimension_semantics=("parallel",)),        # shard batch tiles over TCs
    )(x_c, params["xw"], params["linb_pad"], params["w1t"],
      params["b1"], params["w2t"], params["b2"])

    packed = packed[:B]
    wemb = packed[:, :K]
    linear_out = packed[:, K:K + O]
    inter = packed[:, K + O:K + 2 * O]
    combined = packed[:, K + 2 * O:]
    return combined, linear_out, inter, wemb


def nfm_reference(x, emb_w, lin_w, lin_b, w1, b1, w2, b2):
    linear_out = x @ lin_w.T + lin_b
    wemb = x @ emb_w
    h = jnp.maximum(wemb @ w1.T + b1, 0.0)
    inter = h @ w2.T + b2
    return linear_out + inter, linear_out, inter, wemb


if __name__ == "__main__":
    # Small shapes consistent with the module's forward.
    batch, num_features, k_dim, output_dim = 8, 32, 16, 8

    key = jax.random.PRNGKey(0)
    kx, kxb, ke, klw, klb, k1w, k1b, k2w, k2b = jax.random.split(key, 9)

    x = jax.random.normal(kx, (batch, num_features), dtype=jnp.float32)
    emb_w = jax.random.normal(ke, (num_features, k_dim), dtype=jnp.float32) * 0.1
    lin_w = jax.random.normal(klw, (output_dim, num_features), dtype=jnp.float32) * 0.1
    lin_b = jax.random.normal(klb, (output_dim,), dtype=jnp.float32) * 0.1
    w1 = jax.random.normal(k1w, (k_dim, k_dim), dtype=jnp.float32) * 0.1
    b1 = jax.random.normal(k1b, (k_dim,), dtype=jnp.float32) * 0.1
    w2 = jax.random.normal(k2w, (output_dim, k_dim), dtype=jnp.float32) * 0.1
    b2 = jax.random.normal(k2b, (output_dim,), dtype=jnp.float32) * 0.1
    weights = (emb_w, lin_w, lin_b, w1, b1, w2, b2)

    # --- f32 path, small batch (single grid step) ---
    params_f32 = prepare_nfm_params(*weights)
    outs = jax.block_until_ready(nfm_forward(x, params_f32))
    refs = nfm_reference(x, *weights)
    for o, r in zip(outs, refs):
        assert o.shape == r.shape and o.dtype == r.dtype
        assert jnp.allclose(o, r, atol=2e-2, rtol=2e-2), "f32 mismatch vs reference"

    # --- f32 path, multi-tile grid (batch padding + parallel batch axis) ---
    xb = jax.random.normal(kxb, (300, num_features), dtype=jnp.float32)
    outs_big = jax.block_until_ready(nfm_forward(xb, params_f32, batch_tile=128))
    refs_big = nfm_reference(xb, *weights)
    for o, r in zip(outs_big, refs_big):
        assert o.shape == r.shape
        assert jnp.allclose(o, r, atol=2e-2, rtol=2e-2), "tiled f32 mismatch"

    # --- bf16 compute path (halves input DMA; f32 accumulation/bias/ReLU) ---
    params_bf16 = prepare_nfm_params(*weights, compute_dtype=jnp.bfloat16)
    outs_bf16 = jax.block_until_ready(nfm_forward(xb, params_bf16, batch_tile=128))
    for o, r in zip(outs_bf16, refs_big):
        assert o.shape == r.shape
        assert jnp.allclose(o, r, atol=1.5e-1, rtol=1.5e-1), "bf16 mismatch"

    print("KERNEL_OK")
</pallas_src>

<mosaic_0001>
module attributes {stable_mosaic.version = 11 : i64} {
  func.func @nfm_kernel(%arg0: i32, %arg1: memref<8x32xf32, #tpu.memory_space<vmem>>, %arg2: memref<32x24xf32, #tpu.memory_space<vmem>>, %arg3: memref<1x24xf32, #tpu.memory_space<vmem>>, %arg4: memref<16x16xf32, #tpu.memory_space<vmem>>, %arg5: memref<1x16xf32, #tpu.memory_space<vmem>>, %arg6: memref<16x8xf32, #tpu.memory_space<vmem>>, %arg7: memref<1x8xf32, #tpu.memory_space<vmem>>, %arg8: memref<8x40xf32, #tpu.memory_space<vmem>>) attributes {dimension_semantics = [#tpu.dimension_semantics<parallel>], iteration_bounds = array<i64: 1>, scalar_prefetch = 0 : i64, scratch_operands = 0 : i64, tpu.core_type = #tpu.core_type<tc>, window_params = [{transform_indices = @transform_0, window_bounds = array<i64: 8, 32>}, {pipeline_mode = #tpu.pipeline_mode<synchronous>, transform_indices = @transform_1, window_bounds = array<i64: 32, 24>}, {pipeline_mode = #tpu.pipeline_mode<synchronous>, transform_indices = @transform_2, window_bounds = array<i64: 1, 24>}, {pipeline_mode = #tpu.pipeline_mode<synchronous>, transform_indices = @transform_3, window_bounds = array<i64: 16, 16>}, {pipeline_mode = #tpu.pipeline_mode<synchronous>, transform_indices = @transform_4, window_bounds = array<i64: 1, 16>}, {pipeline_mode = #tpu.pipeline_mode<synchronous>, transform_indices = @transform_5, window_bounds = array<i64: 16, 8>}, {pipeline_mode = #tpu.pipeline_mode<synchronous>, transform_indices = @transform_6, window_bounds = array<i64: 1, 8>}, {transform_indices = @transform_7, window_bounds = array<i64: 8, 40>}]} {
    %c0 = arith.constant 0 : index
    %c0_0 = arith.constant 0 : index
    %0 = vector.load %arg1[%c0, %c0_0] : memref<8x32xf32, #tpu.memory_space<vmem>>, vector<8x32xf32>
    %c0_1 = arith.constant 0 : index
    %c0_2 = arith.constant 0 : index
    %1 = vector.load %arg2[%c0_1, %c0_2] : memref<32x24xf32, #tpu.memory_space<vmem>>, vector<32x24xf32>
    %cst = arith.constant dense<0.000000e+00> : vector<8x24xf32>
    %2 = tpu.matmul %0, %1, %cst {dimension_numbers = #tpu.dot_dimension_numbers<[1], [0], [0], [1], [0, 0, 1, 1], [], []>} : vector<8x32xf32>, vector<32x24xf32>, vector<8x24xf32> -> vector<8x24xf32>
    %c0_3 = arith.constant 0 : index
    %c0_4 = arith.constant 0 : index
    %3 = vector.load %arg3[%c0_3, %c0_4] : memref<1x24xf32, #tpu.memory_space<vmem>>, vector<1x24xf32>
    %4 = vector.broadcast %3 : vector<1x24xf32> to vector<8x24xf32>
    %5 = arith.addf %2, %4 : vector<8x24xf32>
    %6 = vector.extract_strided_slice %5 {offsets = [0, 0], sizes = [8, 16], strides = [1, 1]} : vector<8x24xf32> to vector<8x16xf32>
    %7 = vector.extract_strided_slice %5 {offsets = [0, 16], sizes = [8, 8], strides = [1, 1]} : vector<8x24xf32> to vector<8x8xf32>
    %c0_5 = arith.constant 0 : index
    %c0_6 = arith.constant 0 : index
    %8 = vector.load %arg4[%c0_5, %c0_6] : memref<16x16xf32, #tpu.memory_space<vmem>>, vector<16x16xf32>
    %cst_7 = arith.constant dense<0.000000e+00> : vector<8x16xf32>
    %9 = tpu.matmul %6, %8, %cst_7 {dimension_numbers = #tpu.dot_dimension_numbers<[1], [0], [0], [1], [0, 0, 1, 1], [], []>} : vector<8x16xf32>, vector<16x16xf32>, vector<8x16xf32> -> vector<8x16xf32>
    %c0_8 = arith.constant 0 : index
    %c0_9 = arith.constant 0 : index
    %10 = vector.load %arg5[%c0_8, %c0_9] : memref<1x16xf32, #tpu.memory_space<vmem>>, vector<1x16xf32>
    %11 = vector.broadcast %10 : vector<1x16xf32> to vector<8x16xf32>
    %12 = arith.addf %9, %11 : vector<8x16xf32>
    %cst_10 = arith.constant 0.000000e+00 : f32
    %13 = vector.broadcast %cst_10 : f32 to vector<8x16xf32>
    %14 = arith.maximumf %12, %13 : vector<8x16xf32>
    %c0_11 = arith.constant 0 : index
    %c0_12 = arith.constant 0 : index
    %15 = vector.load %arg6[%c0_11, %c0_12] : memref<16x8xf32, #tpu.memory_space<vmem>>, vector<16x8xf32>
    %cst_13 = arith.constant dense<0.000000e+00> : vector<8x8xf32>
    %16 = tpu.matmul %14, %15, %cst_13 {dimension_numbers = #tpu.dot_dimension_numbers<[1], [0], [0], [1], [0, 0, 1, 1], [], []>} : vector<8x16xf32>, vector<16x8xf32>, vector<8x8xf32> -> vector<8x8xf32>
    %c0_14 = arith.constant 0 : index
    %c0_15 = arith.constant 0 : index
    %17 = vector.load %arg7[%c0_14, %c0_15] : memref<1x8xf32, #tpu.memory_space<vmem>>, vector<1x8xf32>
    %18 = vector.broadcast %17 : vector<1x8xf32> to vector<8x8xf32>
    %19 = arith.addf %16, %18 : vector<8x8xf32>
    %20 = arith.addf %7, %19 : vector<8x8xf32>
    %c0_16 = arith.constant 0 : index
    %c0_17 = arith.constant 0 : index
    %21 = vector.load %arg8[%c0_16, %c0_17] : memref<8x40xf32, #tpu.memory_space<vmem>>, vector<8x24xf32>
    tpu.vector_store %arg8[%c0_16, %c0_17], %5 {strides = array<i32>} : memref<8x40xf32, #tpu.memory_space<vmem>>, vector<8x24xf32>,
    %c0_18 = arith.constant 0 : index
    %c24 = arith.constant 24 : index
    %22 = vector.load %arg8[%c0_18, %c24] : memref<8x40xf32, #tpu.memory_space<vmem>>, vector<8x8xf32>
    tpu.vector_store %arg8[%c0_18, %c24], %19 {strides = array<i32>} : memref<8x40xf32, #tpu.memory_space<vmem>>, vector<8x8xf32>,
    %c0_19 = arith.constant 0 : index
    %c32 = arith.constant 32 : index
    %23 = vector.load %arg8[%c0_19, %c32] : memref<8x40xf32, #tpu.memory_space<vmem>>, vector<8x8xf32>
    tpu.vector_store %arg8[%c0_19, %c32], %20 {strides = array<i32>} : memref<8x40xf32, #tpu.memory_space<vmem>>, vector<8x8xf32>,
    return
  }
  func.func @transform_0(%arg0: i32) -> (i32, i32) {
    %c0_i32 = arith.constant 0 : i32
    %c0_i32_0 = arith.constant 0 : i32
    return %arg0, %c0_i32 : i32, i32
  }
  func.func @transform_1(%arg0: i32) -> (i32, i32) {
    %c0_i32 = arith.constant 0 : i32
    %c0_i32_0 = arith.constant 0 : i32
    %c0_i32_1 = arith.constant 0 : i32
    return %c0_i32, %c0_i32_0 : i32, i32
  }
  func.func @transform_2(%arg0: i32) -> (i32, i32) {
    %c0_i32 = arith.constant 0 : i32
    %c0_i32_0 = arith.constant 0 : i32
    %c0_i32_1 = arith.constant 0 : i32
    return %c0_i32, %c0_i32_0 : i32, i32
  }
  func.func @transform_3(%arg0: i32) -> (i32, i32) {
    %c0_i32 = arith.constant 0 : i32
    %c0_i32_0 = arith.constant 0 : i32
    %c0_i32_1 = arith.constant 0 : i32
    return %c0_i32, %c0_i32_0 : i32, i32
  }
  func.func @transform_4(%arg0: i32) -> (i32, i32) {
    %c0_i32 = arith.constant 0 : i32
    %c0_i32_0 = arith.constant 0 : i32
    %c0_i32_1 = arith.constant 0 : i32
    return %c0_i32, %c0_i32_0 : i32, i32
  }
  func.func @transform_5(%arg0: i32) -> (i32, i32) {
    %c0_i32 = arith.constant 0 : i32
    %c0_i32_0 = arith.constant 0 : i32
    %c0_i32_1 = arith.constant 0 : i32
    return %c0_i32, %c0_i32_0 : i32, i32
  }
  func.func @transform_6(%arg0: i32) -> (i32, i32) {
    %c0_i32 = arith.constant 0 : i32
    %c0_i32_0 = arith.constant 0 : i32
    %c0_i32_1 = arith.constant 0 : i32
    return %c0_i32, %c0_i32_0 : i32, i32
  }
  func.func @transform_7(%arg0: i32) -> (i32, i32) {
    %c0_i32 = arith.constant 0 : i32
    %c0_i32_0 = arith.constant 0 : i32
    return %arg0, %c0_i32 : i32, i32
  }
}

</mosaic_0001>

<bundles_post_ra>
// kernel: tpu_custom_call.1
= control target key start
LH: loop header
LB: loop body
LE: loop exit
PB: predicated region body
PF: predicated region fallthrough
CT: control target
= control target key end

     0   :  { %s271_s0 = inlined_call_operand.vmem [shape: f32[8,32], index: 0, kind: input, shape index: {}]   ;;  %s272_s1 = inlined_call_operand.vmem [shape: f32[32,24], index: 1, kind: input, shape index: {}]   ;;  %s273_s2 = inlined_call_operand.vmem [shape: f32[1,24], index: 2, kind: input, shape index: {}]   ;;  %s274_s3 = inlined_call_operand.vmem [shape: f32[16,16], index: 3, kind: input, shape index: {}]   ;;  %s275_s4 = inlined_call_operand.vmem [shape: f32[1,16], index: 4, kind: input, shape index: {}]   ;;  %s276_s5 = inlined_call_operand.vmem [shape: f32[16,8], index: 5, kind: input, shape index: {}]   ;;  %s277_s6 = inlined_call_operand.vmem [shape: f32[1,8], index: 6, kind: input, shape index: {}]   ;;  %s278_s7 = inlined_call_operand.hbm [shape: f32[8,40], index: 7, kind: output, shape index: {}]  }
   0x1   :  { %v31_v0 = vld [vmem:[%s272_s1 + $0x18] sm:$0xff]  ;;  %v30_v1 = vld [vmem:[%s272_s1 + $0x10] sm:$0xff]  ;;  %v29_v2 = vld [vmem:[%s272_s1 + $0x8] sm:$0xff] }
   0x2   :  { %52 = vmatpush.msra.mxu0 %v31_v0 }
   0x4   :  { %53 = vmatpush.msra.mxu0 %v30_v1 }
   0x5   :  { %12 = vsyncpa [#allocation3], 0  ;;  %v28_v3 = vld [vmem:[%s272_s1] sm:$0xff]  ;;  %vm36_vm0 = vcmask 261120   ;;  %v61_v5 = vld [vmem:[%s274_s3 + $0x8] sm:$0xff]  ;;  %vm66_vm1 = vcmask 130048  }
   0x6   :  { %54 = vmatpush.msra.mxu0 %v29_v2  ;;  %v27_v4 = vld [vmem:[%s271_s0] sm:$0xff]  ;;  %84 = vmatpush.msra.mxu1 %v61_v5  ;;  %vm125_vm2 = vcmask 195584   ;;  %v92_v10 = vld [vmem:[%s276_s5 + $0x8] sm:$0xff]  ;;  %s189_s21 = smov 16   ;;  %s190_s22 = smov 24   ;;  %vm130_vm3 = vcmask 261312  }
   0x7   :  { %v60_v6 = vld [vmem:[%s274_s3] sm:$0xff]  ;;  %114 = vmatpush.msra.mxu2 %v92_v10  ;;  %s145_s25 = sshll.u32 %s278_s7, 4  ;;  %vm136_vm4 = vcmask 326912   ;;  %s146_s25 = int_to_ptr.hbm [resolvable:$true] %s145_s25 }
   0x8   :  { %55 = vmatpush.msra.mxu0 %v28_v3  ;;  %85 = vmatpush.msra.mxu1 %v60_v6  ;;  %v160_v7 = vld [vmem:[%s273_s2] ss:$0 sm:$0xff] }
   0x9   :  { %154 = vmatmul.msk.f32.vlgmr.msra.gmra.mxu0 %vm36_vm0, %v27_v4  ;;  %v91_v11 = vld [vmem:[%s276_s5] sm:$0xff] }
   0xa   :  { %115 = vmatpush.msra.mxu2 %v91_v11  ;;  %v161_v12 = vld [vmem:[%s275_s4] ss:$0 sm:$0xff]  ;;  %s191_s4 = smov [#allocation2]  }
   0xb   :  { %v162_v16 = vld [vmem:[%s277_s6] ss:$0 sm:$0xff]  ;;  %s143_s5 = sshll.u32 %s191_s4, 4  ;;  %s144_s5 = int_to_ptr.vmem [resolvable:$true] %s143_s5 }
  0x86   :  { %v57_v8 = vpop.f32.mrf.mxu0 }
  0x87   :  { %v58_v9 = vadd.f32 %v160_v7, %v57_v8 }
  0x89   :  { %155 = vmatmul.msk.f32.vlgmr.msra.gmra.mxu1 %vm66_vm1, %v58_v9  ;;  %126 = vst.msk [vmem:[#allocation2] sm:$0xff] %vm125_vm2, %v58_v9 }
 0x106   :  { %v87_v13 = vpop.f32.mrf.mxu1 }
 0x107   :  { %v88_v14 = vadd.f32 %v161_v12, %v87_v13 }
 0x109   :  { %v90_v15 = vmax.f32 %v88_v14, 0.0 }
 0x10b   :  { %156 = vmatmul.msk.f32.vlgmr.msra.gmra.mxu2 %vm66_vm1, %v90_v15 }
 0x18e   :  { %v117_v17 = vpop.f32.mrf.mxu2 }
 0x18f   :  { %v118_v18 = vadd.f32 %v162_v16, %v117_v17 }
 0x191   :  { %121 = vrot.lane.b32.xlu0 %v118_v18, %s189_s21 }
 0x199   :  { %127 = vrot.lane.b32.xlu0 %v118_v18, %s190_s22 }
 0x203   :  { %v122_v19 = vpop.permute.xlu0 %121 }
 0x204   :  { %v124_v20 = vadd.f32 %v122_v19, %v58_v9 }
 0x206   :  { %133 = vrot.lane.b32.xlu1 %v124_v20, %s189_s21 }
 0x20b   :  { %v128_v21 = vpop.permute.xlu0 %127 }
 0x20c   :  { %131 = vst.msk [vmem:[#allocation2] sm:$0xff] %vm130_vm3, %v128_v21 }
 0x278   :  { %v134_v22 = vpop.permute.xlu1 %133 }
 0x279   :  { %137 = vst.msk [vmem:[#allocation2] sm:$0xff] %vm136_vm4, %v134_v22 }
 0x27a   :  { %148 = dma.vmem_to_hbm [thread:$0]  %s144_s5, 128, %s146_s25, [#allocation3]  }
 0x27b   :  { %187 = dma.done.wait [#allocation3], 128  }
 0x27c   :  { %188 = vsyncadd [#allocation3], 4294967168 }
 0x27d   :  { %153 = vsyncpa [#allocation3], 1 }

</bundles_post_ra>
